<compile_context>
chip_gen: v5e
topology: v5e:2x2
jax: 0.10.0
libtpu: 0.0.40
codegen_flags: <defaults>
</compile_context>

<pallas_src>
import jax
import jax.numpy as jnp
from jax import lax
from jax.experimental import pallas as pl
from jax.experimental.pallas import tpu as pltpu


def _round_up(x, m):
    return ((x + m - 1) // m) * m


def _sam_ratio_kernel(x_ref, y_ref, ratio_ref):
    # x_ref / y_ref: (1, C, TILE)  -- C on sublanes, pixel tile on lanes
    x = x_ref[...].astype(jnp.float32) + 1e-8
    y = y_ref[...].astype(jnp.float32) + 1e-8

    dot_xy = jnp.sum(x * y, axis=1, keepdims=True)   # (1, 1, TILE)
    nx = jnp.sum(x * x, axis=1, keepdims=True)
    ny = jnp.sum(y * y, axis=1, keepdims=True)

    # ratio = dot / sqrt(nx*ny); rsqrt lands on the EUP (free slot under the DMA).
    ratio_ref[...] = dot_xy * lax.rsqrt(nx * ny)


def sam_loss(output, label):
    """SAM loss for NCHW hyperspectral tensors (spectral angle per pixel, then mean)."""
    B, C, H, W = output.shape
    assert label.shape == output.shape
    HW = H * W

    # Contiguous trailing-dim merge only: no gather, no transpose, no dtype cast.
    x3 = output.reshape(B, C, HW)
    y3 = label.reshape(B, C, HW)

    itemsize = jnp.dtype(output.dtype).itemsize
    c_pad = _round_up(C, 8)

    # Pixel tile on the lane axis: multiple of 128, capped by a ~2 MiB/input-buffer
    # VMEM budget so the double-buffered working set fits comfortably on all gens
    # (incl. v7x's 64 MiB physical VMEM).
    budget_per_in_buf = 2 << 20
    tile_cap = max(128, (budget_per_in_buf // (c_pad * itemsize)) // 128 * 128)
    tile = int(min(tile_cap, _round_up(HW, 128)))
    num_tiles = pl.cdiv(HW, tile)

    # Actual VMEM need: 2 inputs x 2 buffers x (c_pad, tile) + double-buffered output.
    vmem_need = 2 * 2 * c_pad * tile * itemsize + 2 * 8 * tile * 4
    vmem_limit = int(min(32 << 20, max(8 << 20, vmem_need * 3 // 2 + (2 << 20))))

    ratio = pl.pallas_call(
        _sam_ratio_kernel,
        out_shape=jax.ShapeDtypeStruct((B, 1, HW), jnp.float32),
        grid_spec=pltpu.PrefetchScalarGridSpec(
            num_scalar_prefetch=0,
            grid=(B, num_tiles),
            in_specs=[
                pl.BlockSpec((1, C, tile), lambda b, t: (b, 0, t)),
                pl.BlockSpec((1, C, tile), lambda b, t: (b, 0, t)),
            ],
            out_specs=pl.BlockSpec((1, 1, tile), lambda b, t: (b, 0, t)),
        ),
        compiler_params=pltpu.CompilerParams(
            dimension_semantics=("parallel", "parallel"),
            vmem_limit_bytes=vmem_limit,
        ),
    )(x3, y3)

    # Cheap epilogue on the 31x-reduced data (B*H*W elements): angle + global mean.
    angle = jnp.arccos(ratio)
    return jnp.mean(angle)


def _reference_sam_loss(output, label):
    x = output.astype(jnp.float32) + 1e-8
    y = label.astype(jnp.float32) + 1e-8
    ratio = jnp.sum(x * y, axis=1) / jnp.sqrt(
        jnp.sum(x * x, axis=1) * jnp.sum(y * y, axis=1))
    return jnp.mean(jnp.arccos(ratio))


if __name__ == "__main__":
    # Small shapes consistent with the module (hyperspectral: 31 bands).
    B, C, H, W = 2, 31, 16, 16

    key = jax.random.PRNGKey(0)
    k1, k2 = jax.random.split(key, 2)
    # Nonnegative image-like data keeps |ratio| comfortably away from 1.
    output = jax.random.uniform(k1, (B, C, H, W), dtype=jnp.float32)
    label = jax.random.uniform(k2, (B, C, H, W), dtype=jnp.float32)

    loss = jax.block_until_ready(sam_loss(output, label))
    ref = jax.block_until_ready(_reference_sam_loss(output, label))
    assert jnp.abs(loss - ref) < 1e-4, (loss, ref)

    print("KERNEL_OK")
</pallas_src>

<mosaic_0001>
module attributes {stable_mosaic.version = 11 : i64} {
  func.func @_sam_ratio_kernel(%arg0: i32, %arg1: i32, %arg2: memref<1x31x256xf32, #tpu.memory_space<vmem>>, %arg3: memref<1x31x256xf32, #tpu.memory_space<vmem>>, %arg4: memref<1x1x256xf32, #tpu.memory_space<vmem>>) attributes {dimension_semantics = [#tpu.dimension_semantics<parallel>, #tpu.dimension_semantics<parallel>], iteration_bounds = array<i64: 2, 1>, scalar_prefetch = 0 : i64, scratch_operands = 0 : i64, tpu.core_type = #tpu.core_type<tc>, window_params = [{transform_indices = @transform_0, window_bounds = array<i64: 1, 31, 256>}, {transform_indices = @transform_1, window_bounds = array<i64: 1, 31, 256>}, {transform_indices = @transform_2, window_bounds = array<i64: 1, 1, 256>}]} {
    %c0 = arith.constant 0 : index
    %c0_0 = arith.constant 0 : index
    %c0_1 = arith.constant 0 : index
    %0 = vector.load %arg2[%c0, %c0_0, %c0_1] : memref<1x31x256xf32, #tpu.memory_space<vmem>>, vector<1x31x256xf32>
    %cst = arith.constant 9.99999993E-9 : f32
    %1 = vector.broadcast %cst : f32 to vector<1x31x256xf32>
    %2 = arith.addf %0, %1 : vector<1x31x256xf32>
    %c0_2 = arith.constant 0 : index
    %c0_3 = arith.constant 0 : index
    %c0_4 = arith.constant 0 : index
    %3 = vector.load %arg3[%c0_2, %c0_3, %c0_4] : memref<1x31x256xf32, #tpu.memory_space<vmem>>, vector<1x31x256xf32>
    %cst_5 = arith.constant 9.99999993E-9 : f32
    %4 = vector.broadcast %cst_5 : f32 to vector<1x31x256xf32>
    %5 = arith.addf %3, %4 : vector<1x31x256xf32>
    %6 = arith.mulf %2, %5 : vector<1x31x256xf32>
    %cst_6 = arith.constant dense<0.000000e+00> : vector<1x256xf32>
    %7 = vector.multi_reduction <add>, %6, %cst_6 [1] : vector<1x31x256xf32> to vector<1x256xf32>
    %8 = vector.shape_cast %7 : vector<1x256xf32> to vector<1x1x256xf32>
    %9 = arith.mulf %2, %2 : vector<1x31x256xf32>
    %cst_7 = arith.constant dense<0.000000e+00> : vector<1x256xf32>
    %10 = vector.multi_reduction <add>, %9, %cst_7 [1] : vector<1x31x256xf32> to vector<1x256xf32>
    %11 = vector.shape_cast %10 : vector<1x256xf32> to vector<1x1x256xf32>
    %12 = arith.mulf %5, %5 : vector<1x31x256xf32>
    %cst_8 = arith.constant dense<0.000000e+00> : vector<1x256xf32>
    %13 = vector.multi_reduction <add>, %12, %cst_8 [1] : vector<1x31x256xf32> to vector<1x256xf32>
    %14 = vector.shape_cast %13 : vector<1x256xf32> to vector<1x1x256xf32>
    %15 = arith.mulf %11, %14 : vector<1x1x256xf32>
    %16 = math.rsqrt %15 : vector<1x1x256xf32>
    %17 = arith.mulf %8, %16 : vector<1x1x256xf32>
    %c0_9 = arith.constant 0 : index
    %c0_10 = arith.constant 0 : index
    %c0_11 = arith.constant 0 : index
    %18 = vector.load %arg4[%c0_9, %c0_10, %c0_11] : memref<1x1x256xf32, #tpu.memory_space<vmem>>, vector<1x1x256xf32>
    tpu.vector_store %arg4[%c0_9, %c0_10, %c0_11], %17 {strides = array<i32>} : memref<1x1x256xf32, #tpu.memory_space<vmem>>, vector<1x1x256xf32>,
    return
  }
  func.func @transform_0(%arg0: i32, %arg1: i32) -> (i32, i32, i32) {
    %c0_i32 = arith.constant 0 : i32
    %c0_i32_0 = arith.constant 0 : i32
    return %arg0, %c0_i32, %arg1 : i32, i32, i32
  }
  func.func @transform_1(%arg0: i32, %arg1: i32) -> (i32, i32, i32) {
    %c0_i32 = arith.constant 0 : i32
    %c0_i32_0 = arith.constant 0 : i32
    return %arg0, %c0_i32, %arg1 : i32, i32, i32
  }
  func.func @transform_2(%arg0: i32, %arg1: i32) -> (i32, i32, i32) {
    %c0_i32 = arith.constant 0 : i32
    %c0_i32_0 = arith.constant 0 : i32
    return %arg0, %c0_i32, %arg1 : i32, i32, i32
  }
}

</mosaic_0001>

<bundles_post_ra>
// kernel: tpu_custom_call.1
= control target key start
LH: loop header
LB: loop body
LE: loop exit
PB: predicated region body
PF: predicated region fallthrough
CT: control target
= control target key end

     0   :  { %7 = vsyncpa [#allocation3], 0  ;;  %s752_s0 = inlined_call_operand.vmem [shape: f32[2,31,256], index: 0, kind: input, shape index: {}]   ;;  %s753_s1 = inlined_call_operand.vmem [shape: f32[2,31,256], index: 1, kind: input, shape index: {}]   ;;  %s754_s2 = inlined_call_operand.hbm [shape: f32[2,1,256], index: 2, kind: output, shape index: {}]  }
   0x1   :  { %9 = vsyncpa [#allocation3 + $0x1], 0  ;;  %s642_s9 = smov 0   ;;  %s644_s10 = smov 0  }
   0x2   :  { %s646_s11 = smov 0   ;;  %s648_s12 = smov 0  }
   0x3   :  { %s650_s13 = smov 0   ;;  %s652_s14 = smov 0  }
   0x4 LB: > { %s472_s15 = sadd.s32 4294967295, %s625_s14   ;;  %s473_s16 = sadd.s32 4294967294, %s625_s14   ;;  %s625_s14 = sphi %s652_s14, %s15_s14   ;;  %s621_s13 = sphi %s650_s13, %s761_s13   ;;  %s617_s12 = sphi %s648_s12, %s760_s12   ;;  %s613_s11 = sphi %s646_s11, %s759_s11   ;;  %s609_s10 = sphi %s644_s10, %s758_s10   ;;  %s605_s9 = sphi %s642_s9, %s757_s9  }
   0x5   : > { %s27_s17 = sadd.s32 1, %s621_s13  ;;  %s92_s18 = sadd.s32 1, %s613_s11 }
   0x6   : > { %p29_p0 = scmp.ge.s32.totalorder %s27_s17, 2  ;;  %p102_p1 = scmp.ne.s32.totalorder %s613_s11, %s609_s10 }
   0x7   : > { %p103_p2 = scmp.eq.s32.totalorder %s472_s15, 1  ;;  %p108_p3 = scmp.ne.s32.totalorder %s609_s10, %s605_s9 }
   0x8   : > { %s763_s17 = smov (%p29_p0, %s27_s17), 0  ;;  %p109_p5 = scmp.eq.s32.totalorder %s473_s16, 1 }
   0x9   : > { %p682_p4 = por %p103_p2, %p102_p1  ;;  %s87_s20 = ssub.s32 %s621_s13, %s763_s17 }
   0xa   : > { %p476_p6 = scmp.ge.s32.totalorder %s625_s14, 1  ;;  %p90_p7 = scmp.eq.s32.totalorder %s87_s20, 0 }
   0xb   : > { %p689_p8 = por %p109_p5, %p108_p3  ;;  %p153_p9 = scmp.lt.s32.totalorder %s625_s14, 3 }
   0xc   : > { %s695_s22 = scalar_select %p90_p7, %s613_s11, %s92_s18  }
   0xd   : > { %p154_p10 = pnand %p476_p6, %p153_p9 }
   0xe   : > { %p189_p11 = scmp.lt.s32.totalorder (!%p154_p10), %s617_s12, 1  ;;  %s185_s3 = sand.u32 (!%p154_p10), 1, %s609_s10  }
   0xf   : > { %157 = sbr.rel (%p154_p10) target bundleno = 86 (0x56), region = 28  ;;  %s477_s4 = sshll.u32 (!%p154_p10), %s185_s3, 1 }
  0x10   : > { %s483_s5 = sshll.u32 (!%p154_p10), %s617_s12, 1  ;;  %s187_s15 = scalar_lea.vmem (!%p154_p10), [#allocation2], %s477_s4 }
  0x11   : > { %s374_s8 = scalar_lea.hbm (!%p154_p10), %s754_s2, %s483_s5  ;;  %s376_s16 = sshll.u32 (!%p154_p10), %s187_s15, 4  ;;  %s377_s16 = int_to_ptr.vmem [resolvable:$true] %s376_s16 }
  0x12   : > { %s362_s18 = scalar_lea.sflag (!%p154_p10), [#allocation3], %s185_s3  ;;  %s567_s26 = scalar_lea.hbm (!%p154_p10), %s754_s2, 4 }
  0x14   : > { %s190_s23 = scalar_select %p189_p11, %s617_s12, 1  ;;  %vm251_vm0 = vcmask 1046528   ;;  %vm353_vm7 = vcmask 1040384  }
  0x15   : > { %s378_s12 = sshll.u32 %s374_s8, 4  ;;  %s379_s12 = int_to_ptr.hbm [resolvable:$true] %s378_s12 }
  0x16   : > { %s486_s24 = sshll.u32 %s190_s23, 6  ;;  %s561_s20 = sshra.s32 %s379_s12, 4  ;;  %s562_s20 = int_to_ptr.hbm [resolvable:$true] %s561_s20 }
  0x17   : > { %s196_s27 = scalar_lea.vmem %s752_s0, %s486_s24  ;;  %s206_s30 = scalar_lea.vmem %s753_s1, %s486_s24 }
  0x18   : > { %v209_v0 = vld [vmem:[%s196_s27] sm:$0xff]  ;;  %v210_v1 = vld [vmem:[%s196_s27 + $0x8] sm:$0xff]  ;;  %v211_v2 = vld [vmem:[%s196_s27 + $0x10] sm:$0xff]  ;;  %s563_s23 = scalar_lea.hbm %s562_s20, 2  ;;  %p568_p1 = scmp.lt.s32.totalorder %s562_s20, %s754_s2 }
  0x19   : > { %v212_v3 = vld [vmem:[%s196_s27 + $0x18] sm:$0xff]  ;;  %v213_v4 = vld [vmem:[%s196_s27 + $0x20] sm:$0xff]  ;;  %v214_v5 = vld [vmem:[%s196_s27 + $0x28] sm:$0xff]  ;;  %v217_v6 = vadd.f32 1e-08, %v209_v0  ;;  %p564_p12 = scmp.ne.s32.totalorder %s562_s20, %s563_s23  ;;  %p569_p2 = scmp.lt.s32.totalorder %s567_s26, %s563_s23 }
  0x1a   : > { %v215_v7 = vld [vmem:[%s196_s27 + $0x30] sm:$0x7f]  ;;  %v216_v8 = vld [vmem:[%s196_s27 + $0x38] sm:$0x7f]  ;;  %v218_v9 = vadd.f32 1e-08, %v210_v1 }
  0x1b   : > { %v219_v10 = vadd.f32 1e-08, %v211_v2  ;;  %v220_v11 = vadd.f32 1e-08, %v212_v3  ;;  %v221_v12 = vadd.f32 1e-08, %v213_v4  ;;  %v270_v13 = vmul.f32 %v217_v6, %v217_v6  ;;  %p565_p13 = pnand %p564_p12, %p682_p4  ;;  %p570_p3 = por %p569_p2, %p568_p1 }
  0x1c   : > { %v222_v14 = vadd.f32 1e-08, %v214_v5  ;;  %v223_v15 = vadd.f32 1e-08, %v215_v7  ;;  %v271_v16 = vmul.f32 %v218_v9, %v218_v9  ;;  %v224_v17 = vadd.f32 1e-08, %v216_v8 }
  0x1d   : > { %v272_v18 = vmul.f32 %v219_v10, %v219_v10  ;;  %v273_v19 = vmul.f32 %v220_v11, %v220_v11  ;;  %v225_v20 = vld [vmem:[%s206_s30] sm:$0xff]  ;;  %v274_v21 = vmul.f32 %v221_v12, %v221_v12  ;;  %v226_v22 = vld [vmem:[%s206_s30 + $0x8] sm:$0xff]  ;;  %v227_v23 = vld [vmem:[%s206_s30 + $0x10] sm:$0xff]  ;;  %p566_p0 = pneg %p565_p13 }
  0x1e   : > { %v276_v24 = vmul.f32 %v223_v15, %v223_v15  ;;  %v228_v26 = vld [vmem:[%s206_s30 + $0x18] sm:$0xff]  ;;  %v229_v27 = vld [vmem:[%s206_s30 + $0x20] sm:$0xff]  ;;  %v275_v28 = vmul.f32 %v222_v14, %v222_v14  ;;  %v230_v30 = vld [vmem:[%s206_s30 + $0x28] sm:$0xff]  ;;  %v233_v32 = vadd.f32 1e-08, %v225_v20  ;;  %v277_v33 = vmul.f32 %v224_v17, %v224_v17 }
  0x1f   : > { %v278_v25 = vadd.f32 %v272_v18, %v270_v13  ;;  %v288_v29 = vadd.f32 %v273_v19, %v271_v16  ;;  %v231_v31 = vld [vmem:[%s206_s30 + $0x30] sm:$0x7f]  ;;  %v232_v34 = vld [vmem:[%s206_s30 + $0x38] sm:$0x7f]  ;;  %v234_v35 = vadd.f32 1e-08, %v226_v22  ;;  %p571_p5 = pnand %p570_p3, %p566_p0 }
  0x20   : > { %v235_v36 = vadd.f32 1e-08, %v227_v23  ;;  %v236_v38 = vadd.f32 1e-08, %v228_v26  ;;  %v237_v39 = vadd.f32 1e-08, %v229_v27  ;;  %v298_v47 = vmul.f32 %v233_v32, %v233_v32 }
  0x21   : > { %v279_v37 = vadd.f32 %v278_v25, %v274_v21  ;;  %v280_v40 = vsel %vm251_vm0, %v276_v24, 0.0  ;;  %v238_v41 = vadd.f32 1e-08, %v230_v30  ;;  %v289_v43 = vadd.f32 %v288_v29, %v275_v28 }
  0x22   : > { %v239_v44 = vadd.f32 1e-08, %v231_v31  ;;  %v240_v45 = vadd.f32 1e-08, %v232_v34  ;;  %v290_v46 = vsel %vm251_vm0, %v277_v33, 0.0  ;;  %v241_v48 = vmul.f32 %v233_v32, %v217_v6 }
  0x23   : > { %v281_v42 = vadd.f32 %v280_v40, %v279_v37  ;;  %v242_v49 = vmul.f32 %v234_v35, %v218_v9  ;;  %v291_v51 = vadd.f32 %v290_v46, %v289_v43  ;;  %v299_v52 = vmul.f32 %v234_v35, %v234_v35 }
  0x24   : > { %v300_v53 = vmul.f32 %v235_v36, %v235_v36  ;;  %v301_v54 = vmul.f32 %v236_v38, %v236_v38  ;;  %v302_v55 = vmul.f32 %v237_v39, %v237_v39  ;;  %v243_v56 = vmul.f32 %v235_v36, %v219_v10 }
  0x25   : > { %v282_v50 = vrot.slane %v281_v42, 4  ;;  %v244_v57 = vmul.f32 %v236_v38, %v220_v11  ;;  %v292_v59 = vrot.slane %v291_v51, 4  ;;  %v303_v60 = vmul.f32 %v238_v41, %v238_v41 }
  0x26   : > { %v304_v61 = vmul.f32 %v239_v44, %v239_v44  ;;  %v305_v62 = vmul.f32 %v240_v45, %v240_v45  ;;  %v306_v63 = vadd.f32 %v300_v53, %v298_v47  ;;  %v245_v0 = vmul.f32 %v237_v39, %v221_v12 }
  0x27   : > { %v283_v58 = vadd.f32 %v282_v50, %v281_v42  ;;  %v293_v1 = vadd.f32 %v292_v59, %v291_v51  ;;  %v316_v5 = vadd.f32 %v301_v54, %v299_v52  ;;  %v246_v6 = vmul.f32 %v238_v41, %v222_v14 }
  0x28   : > { %v307_v3 = vadd.f32 %v306_v63, %v302_v55  ;;  %v308_v4 = vsel %vm251_vm0, %v304_v61, 0.0  ;;  %v247_v7 = vmul.f32 %v239_v44, %v223_v15  ;;  %v249_v8 = vadd.f32 %v243_v56, %v241_v48 }
  0x29   : > { %v284_v2 = vrot.slane %v283_v58, 2  ;;  %v318_v9 = vsel %vm251_vm0, %v305_v62, 0.0  ;;  %v260_v10 = vadd.f32 %v244_v57, %v242_v49  ;;  %v294_v11 = vrot.slane %v293_v1, 2 }
  0x2a   : > { %v309_v13 = vadd.f32 %v308_v4, %v307_v3  ;;  %v317_v16 = vadd.f32 %v316_v5, %v303_v60  ;;  %v248_v18 = vmul.f32 %v240_v45, %v224_v17  ;;  %v250_v12 = vadd.f32 %v249_v8, %v245_v0 }
  0x2b   : > { %v285_v19 = vadd.f32 %v284_v2, %v283_v58  ;;  %v252_v22 = vsel %vm251_vm0, %v247_v7, 0.0  ;;  %v261_v23 = vadd.f32 %v260_v10, %v246_v6  ;;  %v295_v24 = vadd.f32 %v294_v11, %v293_v1 }
  0x2c   : > { %v310_v20 = vrot.slane %v309_v13, 4  ;;  %v319_v21 = vadd.f32 %v318_v9, %v317_v16  ;;  %v262_v14 = vsel %vm251_vm0, %v248_v18, 0.0  ;;  %v253_v29 = vadd.f32 %v252_v22, %v250_v12 }
  0x2d   : > { %v286_v15 = vrot.slane %v285_v19, 1  ;;  %v263_v30 = vadd.f32 %v262_v14, %v261_v23  ;;  %v296_v31 = vrot.slane %v295_v24, 1  ;;  %v356_v3 = vlaneseq }
  0x2e   : > { %v311_v25 = vadd.f32 %v310_v20, %v309_v13  ;;  %v320_v26 = vrot.slane %v319_v21, 4  ;;  %v254_v36 = vrot.slane %v253_v29, 4 }
  0x2f   : > { %v287_v33 = vadd.f32 %v286_v15, %v285_v19  ;;  %v264_v37 = vrot.slane %v263_v30, 4  ;;  %v297_v38 = vadd.f32 %v296_v31, %v295_v24  ;;  %vm358_vm8 = vcmp.lt.s32.totalorder %v356_v3, 256 }
  0x30   : > { %v312_v27 = vrot.slane %v311_v25, 2  ;;  %v321_v28 = vadd.f32 %v320_v26, %v319_v21  ;;  %v255_v43 = vadd.f32 %v254_v36, %v253_v29 }
  0x31   : > { %v265_v44 = vadd.f32 %v264_v37, %v263_v30 }
  0x32   : > { %v313_v32 = vadd.f32 %v312_v27, %v311_v25  ;;  %v322_v17 = vrot.slane %v321_v28, 2  ;;  %v256_v46 = vrot.slane %v255_v43, 2 }
  0x33   : > { %v266_v47 = vrot.slane %v265_v44, 2 }
  0x34   : > { %v314_v34 = vrot.slane %v313_v32, 1  ;;  %v323_v35 = vadd.f32 %v322_v17, %v321_v28  ;;  %v257_v51 = vadd.f32 %v256_v46, %v255_v43 }
  0x35   : > { %v267_v52 = vadd.f32 %v266_v47, %v265_v44 }
  0x36   : > { %v315_v39 = vadd.f32 %v314_v34, %v313_v32  ;;  %v324_v40 = vrot.slane %v323_v35, 1  ;;  %v258_v57 = vrot.slane %v257_v51, 1 }
  0x37   : > { %v268_v58 = vrot.slane %v267_v52, 1 }
  0x38   : > { %v325_v41 = vadd.f32 %v324_v40, %v323_v35  ;;  %v326_v42 = vmul.f32 %v315_v39, %v287_v33  ;;  %v259_v63 = vadd.f32 %v258_v57, %v257_v51 }
  0x39   : > { %v269_v0 = vadd.f32 %v268_v58, %v267_v52 }
  0x3a   : > { %v327_v45 = vmul.f32 %v325_v41, %v297_v38  ;;  %543 = vrsqrt.f32 %v326_v42  ;;  %vm334_vm1 = vweird.f32 %v326_v42 }
  0x3c   : > { %545 = vrsqrt.f32 %v327_v45  ;;  %vm344_vm3 = vweird.f32 %v327_v45 }
  0x40   : > { %v544_v48 = vpop.eup %543 }
  0x41   : > { %v329_v49 = vmul.f32 %v544_v48, %v326_v42  ;;  %vm335_vm2 = vweird.f32 %v544_v48 }
  0x42   : > { %v546_v50 = vpop.eup %545  ;;  %vm336_vm5 = vmor %vm334_vm1, %vm335_vm2 }
  0x43   : > { %v330_v53 = vmul.f32 %v544_v48, %v329_v49  ;;  %v339_v54 = vmul.f32 %v546_v50, %v327_v45  ;;  %vm345_vm4 = vweird.f32 %v546_v50 }
  0x44   : > { %vm346_vm6 = vmor %vm344_vm3, %vm345_vm4 }
  0x45   : > { %v331_v55 = vmul.f32 0.5, %v330_v53  ;;  %v340_v56 = vmul.f32 %v546_v50, %v339_v54 }
  0x47   : > { %v332_v59 = vsub.f32 1.5, %v331_v55  ;;  %v341_v60 = vmul.f32 0.5, %v340_v56 }
  0x49   : > { %v333_v61 = vmul.f32 %v544_v48, %v332_v59  ;;  %v342_v62 = vsub.f32 1.5, %v341_v60 }
  0x4b   : > { %v337_v1 = vsel %vm336_vm5, %v544_v48, %v333_v61  ;;  %v343_v2 = vmul.f32 %v546_v50, %v342_v62 }
  0x4c   : > { %v348_v5 = vmul.f32 %v337_v1, %v259_v63 }
  0x4d   : > { %v347_v4 = vsel %vm346_vm6, %v546_v50, %v343_v2 }
  0x4e   : > { %v349_v6 = vmul.f32 %v347_v4, %v269_v0 }
  0x50   : > { %v352_v7 = vrot.slane %v349_v6, 7 }
  0x52   : > { %v354_v8 = vsel %vm353_vm7, %v348_v5, %v352_v7 }
  0x53   : > { %360 = vst.msk [vmem:[%s187_s15] sm:$0x3] %vm358_vm8, %v354_v8 }
  0x54   : > { %574 = shalt.err (!%p571_p5)
}
  0x55   : > { %488 = dma.vmem_to_hbm [thread:$0]  (%p682_p4), %s377_s16, 32, %s379_s12, %s362_s18  }
  0x56 PF: > { %p494_p6 = scmp.ge.s32.totalorder %s625_s14, 2  ;;  %s390_s29 = sand.u32 1, %s605_s9  }
  0x57   : > { %s391_s30 = scalar_lea.sflag [#allocation3], %s390_s29 }
  0x58   : > { %p491_p7 = pnand %p494_p6, %p689_p8 }
  0x5a   : > { %p492_p9 = pneg %p491_p7 }
  0x5c   : > { %600 = dma.done.wait (%p492_p9), %s391_s30, 32  }
  0x5d   : > { %602 = vsyncadd (%p492_p9), %s391_s30, 4294967264  ;;  %s15_s14 = sadd.s32 1, %s625_s14   ;;  %s757_s9 = smov %s609_s10 }
  0x5e   : > { %p12_p10 = scmp.ge.s32.totalorder %s15_s14, 4   ;;  %s758_s10 = smov %s613_s11 }
  0x5f   : > { %s759_s11 = smov %s695_s22  ;;  %s760_s12 = smov %s621_s13 }
  0x60   : > { %s761_s13 = smov %s763_s17  ;;  %14 = sbr.rel (!%p12_p10) target bundleno = 4 (0x4), region = 66 }
  0x65   :  { %397 = vsyncpa [#allocation3], 1 }
  0x66   :  { %399 = vsyncpa [#allocation3 + $0x1], 1 }

</bundles_post_ra>
